<compile_context>
chip_gen: v6e
topology: v6e:2x2x1
jax: 0.10.0
libtpu: 0.0.40
codegen_flags: <defaults>
</compile_context>

<pallas_src>
import jax
import jax.numpy as jnp
from jax.experimental import pallas as pl
from jax.experimental.pallas import tpu as pltpu


def _linear_1x1_kernel(x_ref, w_ref, b_ref, o_ref):
    # x_ref: (C_in, tile_hw)     activation tile, lanes = spatial positions
    # w_ref: (tile_cout, C_in)   weight tile (PyTorch layout, no transpose)
    # b_ref: (tile_cout, 1)      bias column (broadcasts over lanes)
    # o_ref: (tile_cout, tile_hw)
    acc = jnp.dot(w_ref[...], x_ref[...], preferred_element_type=jnp.float32)
    o_ref[...] = (acc + b_ref[...]).astype(o_ref.dtype)


def linear_1x1_conv(x_nchw, weight, bias, *, tile_hw=512, tile_cout=256,
                    compute_dtype=jnp.float32):
    """1x1 Conv2d with bias (PyTorch `linear` module) via Pallas matmul.

    x_nchw: (B, C_in, H, W)
    weight: (C_out, C_in)     (PyTorch Conv2d weight is (C_out, C_in, 1, 1))
    bias:   (C_out,)
    returns (B, C_out, H, W) float32
    """
    B, C_in, H, W = x_nchw.shape
    C_out = weight.shape[0]
    HW = H * W

    # --- tile sizes -------------------------------------------------------
    # Lane (last) dim: multiple of 128, or the full extent.
    if HW % 128 == 0:
        t_hw = min(tile_hw, HW)
        t_hw = max(128, (t_hw // 128) * 128)
    else:
        t_hw = HW  # full-extent last dim is always legal
    # C_out tile: full if small, else a multiple of 8 (keeps weight/out tiles
    # small enough for v7x's 64 MiB VMEM when channel counts are large).
    if C_out <= tile_cout:
        t_co = C_out
    else:
        t_co = max(8, (tile_cout // 8) * 8)
    # NOTE: for very large C_in one would also tile the contraction (K) axis
    # with a VMEM f32 accumulator + pl.when init/finalize; not needed here.

    grid = (B, pl.cdiv(C_out, t_co), pl.cdiv(HW, t_hw))

    # --- operands (reshapes only; no transposes, no jnp.pad) --------------
    x3 = x_nchw.reshape(B, C_in, HW).astype(compute_dtype)
    w = weight.astype(compute_dtype)                     # (C_out, C_in)
    b = bias.reshape(C_out, 1).astype(jnp.float32)       # (C_out, 1)

    # --- explicit VMEM budget (double-buffered tiles + headroom) ----------
    c_item = jnp.dtype(compute_dtype).itemsize
    need = 2 * (C_in * t_hw * c_item          # x tile
                + t_co * C_in * c_item        # weight tile
                + t_co * t_hw * 4             # output tile (f32)
                + t_co * 4)                   # bias tile
    vmem_limit = int(min(max(2 * need, 32 << 20), 56 << 20))

    out3 = pl.pallas_call(
        _linear_1x1_kernel,
        out_shape=jax.ShapeDtypeStruct((B, C_out, HW), jnp.float32),
        grid_spec=pltpu.PrefetchScalarGridSpec(
            num_scalar_prefetch=0,
            grid=grid,
            in_specs=[
                # activations: batch squeezed, lanes = spatial
                pl.BlockSpec((None, C_in, t_hw), lambda bi, co, hw: (bi, 0, hw)),
                # weight: constant along B/HW axes -> DMA'd once per C_out tile
                pl.BlockSpec((t_co, C_in), lambda bi, co, hw: (co, 0)),
                # bias column
                pl.BlockSpec((t_co, 1), lambda bi, co, hw: (co, 0)),
            ],
            out_specs=pl.BlockSpec((None, t_co, t_hw),
                                   lambda bi, co, hw: (bi, co, hw)),
        ),
        compiler_params=pltpu.CompilerParams(
            dimension_semantics=("parallel", "parallel", "parallel"),
            vmem_limit_bytes=vmem_limit,
        ),
    )(x3, w, b)

    return out3.reshape(B, C_out, H, W)


if __name__ == "__main__":
    key = jax.random.PRNGKey(0)
    kx, kw, kb = jax.random.split(key, 3)

    B, C_in, C_out, Hs, Ws = 2, 4, 8, 16, 16

    x = jax.random.normal(kx, (B, C_in, Hs, Ws), dtype=jnp.float32)
    # Deterministic parameters (mimic Conv2d(c_in, c_out, kernel_size=1) shapes)
    weight = jax.random.normal(kw, (C_out, C_in), dtype=jnp.float32) * 0.1
    bias = jax.random.normal(kb, (C_out,), dtype=jnp.float32) * 0.1

    # f32 path
    out = jax.block_until_ready(linear_1x1_conv(x, weight, bias))

    # Reference (plain JAX): 1x1 conv == channel matmul + bias
    ref = jnp.einsum("bchw,oc->bohw", x, weight) + bias[None, :, None, None]
    assert out.shape == (B, C_out, Hs, Ws)
    assert jnp.allclose(out, ref, atol=1e-5, rtol=1e-5)

    # bf16 path (halves HBM traffic on v6e/v7x); looser tolerance for bf16 rounding
    out_bf16 = jax.block_until_ready(
        linear_1x1_conv(x, weight, bias, compute_dtype=jnp.bfloat16))
    assert jnp.allclose(out_bf16, ref, atol=2e-2, rtol=2e-2)

    print("KERNEL_OK")
</pallas_src>

<mosaic_0001>
module attributes {stable_mosaic.version = 11 : i64} {
  func.func @_linear_1x1_kernel(%arg0: i32, %arg1: i32, %arg2: i32, %arg3: memref<1x4x256xf32, #tpu.memory_space<vmem>>, %arg4: memref<8x4xf32, #tpu.memory_space<vmem>>, %arg5: memref<8x1xf32, #tpu.memory_space<vmem>>, %arg6: memref<1x8x256xf32, #tpu.memory_space<vmem>>) attributes {dimension_semantics = [#tpu.dimension_semantics<parallel>, #tpu.dimension_semantics<parallel>, #tpu.dimension_semantics<parallel>], iteration_bounds = array<i64: 2, 1, 1>, scalar_prefetch = 0 : i64, scratch_operands = 0 : i64, tpu.core_type = #tpu.core_type<tc>, window_params = [{transform_indices = @transform_0, window_bounds = array<i64: 1, 4, 256>}, {transform_indices = @transform_1, window_bounds = array<i64: 8, 4>}, {transform_indices = @transform_2, window_bounds = array<i64: 8, 1>}, {transform_indices = @transform_3, window_bounds = array<i64: 1, 8, 256>}]} {
    %c0 = arith.constant 0 : index
    %c0_0 = arith.constant 0 : index
    %0 = vector.load %arg4[%c0, %c0_0] : memref<8x4xf32, #tpu.memory_space<vmem>>, vector<8x4xf32>
    %c0_1 = arith.constant 0 : index
    %c0_2 = arith.constant 0 : index
    %c0_3 = arith.constant 0 : index
    %1 = vector.load %arg3[%c0_1, %c0_2, %c0_3] : memref<1x4x256xf32, #tpu.memory_space<vmem>>, vector<1x4x256xf32>
    %2 = vector.shape_cast %1 : vector<1x4x256xf32> to vector<4x256xf32>
    %cst = arith.constant dense<0.000000e+00> : vector<8x256xf32>
    %3 = tpu.matmul %0, %2, %cst {dimension_numbers = #tpu.dot_dimension_numbers<[1], [0], [0], [1], [0, 0, 1, 1], [], []>} : vector<8x4xf32>, vector<4x256xf32>, vector<8x256xf32> -> vector<8x256xf32>
    %c0_4 = arith.constant 0 : index
    %c0_5 = arith.constant 0 : index
    %4 = vector.load %arg5[%c0_4, %c0_5] : memref<8x1xf32, #tpu.memory_space<vmem>>, vector<8x1xf32>
    %5 = vector.broadcast %4 : vector<8x1xf32> to vector<8x256xf32>
    %6 = arith.addf %3, %5 : vector<8x256xf32>
    %c0_6 = arith.constant 0 : index
    %c0_7 = arith.constant 0 : index
    %c0_8 = arith.constant 0 : index
    %7 = vector.load %arg6[%c0_6, %c0_7, %c0_8] : memref<1x8x256xf32, #tpu.memory_space<vmem>>, vector<1x8x256xf32>
    %8 = vector.shape_cast %7 : vector<1x8x256xf32> to vector<8x256xf32>
    %9 = vector.shape_cast %6 : vector<8x256xf32> to vector<1x8x256xf32>
    tpu.vector_store %arg6[%c0_6, %c0_7, %c0_8], %9 {strides = array<i32>} : memref<1x8x256xf32, #tpu.memory_space<vmem>>, vector<1x8x256xf32>,
    return
  }
  func.func @transform_0(%arg0: i32, %arg1: i32, %arg2: i32) -> (i32, i32, i32) {
    %c0_i32 = arith.constant 0 : i32
    %c0_i32_0 = arith.constant 0 : i32
    return %arg0, %c0_i32, %arg2 : i32, i32, i32
  }
  func.func @transform_1(%arg0: i32, %arg1: i32, %arg2: i32) -> (i32, i32) {
    %c0_i32 = arith.constant 0 : i32
    %c0_i32_0 = arith.constant 0 : i32
    return %arg1, %c0_i32 : i32, i32
  }
  func.func @transform_2(%arg0: i32, %arg1: i32, %arg2: i32) -> (i32, i32) {
    %c0_i32 = arith.constant 0 : i32
    %c0_i32_0 = arith.constant 0 : i32
    return %arg1, %c0_i32 : i32, i32
  }
  func.func @transform_3(%arg0: i32, %arg1: i32, %arg2: i32) -> (i32, i32, i32) {
    %c0_i32 = arith.constant 0 : i32
    return %arg0, %arg1, %arg2 : i32, i32, i32
  }
}

</mosaic_0001>

<bundles_post_ra>
// kernel: tpu_custom_call.1
= control target key start
LH: loop header
LB: loop body
LE: loop exit
PB: predicated region body
PF: predicated region fallthrough
CT: control target
= control target key end

     0   :  { %8 = vsyncpa [#allocation3], 0  ;;  %s750_s0 = inlined_call_operand.vmem [shape: f32[2,4,256], index: 0, kind: input, shape index: {}]   ;;  %s751_s1 = inlined_call_operand.vmem [shape: f32[8,4], index: 1, kind: input, shape index: {}]   ;;  %s752_s2 = inlined_call_operand.vmem [shape: f32[8,1], index: 2, kind: input, shape index: {}]   ;;  %s753_s3 = inlined_call_operand.hbm [shape: f32[2,8,256], index: 3, kind: output, shape index: {}]  }
   0x1   :  { %10 = vsyncpa [#allocation3 + $0x1], 0  ;;  %s645_s12 = smov 0   ;;  %s647_s13 = smov 0  }
   0x2   :  { %s649_s14 = smov 0   ;;  %s651_s15 = smov 0  }
   0x3   :  { %s653_s16 = smov 0   ;;  %s655_s17 = smov 0  }
   0x4 LB: > { %s465_s18 = sadd.s32 4294967295, %s620_s17   ;;  %s466_s19 = sadd.s32 4294967294, %s620_s17   ;;  %s620_s17 = sphi %s655_s17, %s16_s17   ;;  %s616_s16 = sphi %s653_s16, %s760_s16   ;;  %s612_s15 = sphi %s651_s15, %s759_s15   ;;  %s608_s14 = sphi %s649_s14, %s758_s14   ;;  %s604_s13 = sphi %s647_s13, %s757_s13   ;;  %s600_s12 = sphi %s645_s12, %s756_s12  }
   0x5   : > { %s35_s20 = sadd.s32 1, %s616_s16  ;;  %s126_s21 = sadd.s32 1, %s608_s14 }
   0x6   : > { %p37_p0 = scmp.ge.s32.totalorder %s35_s20, 2  ;;  %p136_p1 = scmp.ne.s32.totalorder %s608_s14, %s604_s13 }
   0x7   : > { %p137_p2 = scmp.eq.s32.totalorder %s465_s18, 1  ;;  %p142_p3 = scmp.ne.s32.totalorder %s604_s13, %s600_s12 }
   0x8   : > { %s762_s20 = smov (%p37_p0, %s35_s20), 0  ;;  %p143_p5 = scmp.eq.s32.totalorder %s466_s19, 1 }
   0x9   : > { %p685_p4 = por %p137_p2, %p136_p1  ;;  %s119_s23 = ssub.s32 %s616_s16, %s762_s20 }
   0xa   : > { %p471_p6 = scmp.ge.s32.totalorder %s620_s17, 1  ;;  %p124_p7 = scmp.eq.s32.totalorder %s119_s23, 0 }
   0xb   : > { %p692_p8 = por %p143_p5, %p142_p3  ;;  %p188_p9 = scmp.lt.s32.totalorder %s620_s17, 3 }
   0xc   : > { %s698_s25 = scalar_select %p124_p7, %s608_s14, %s126_s21  }
   0xd   : > { %p189_p10 = pnand %p471_p6, %p188_p9 }
   0xe   : > { %p225_p11 = scmp.lt.s32.totalorder (!%p189_p10), %s612_s15, 1  ;;  %s221_s8 = sand.u32 (!%p189_p10), 1, %s604_s13  }
   0xf   : > { %192 = sbr.rel (%p189_p10) target bundleno = 239 (0xef), region = 32  ;;  %s472_s9 = sshll.u32 (!%p189_p10), %s221_s8, 4 }
  0x10   : > { %s484_s10 = sshll.u32 (!%p189_p10), %s612_s15, 8  ;;  %s223_s11 = scalar_lea.vmem (!%p189_p10), [#allocation2], %s472_s9 }
  0x11   : > { %s354_s18 = sshll.u32 (!%p189_p10), %s223_s11, 4  ;;  %s352_s23 = scalar_lea.hbm (!%p189_p10), %s753_s3, %s484_s10  ;;  %s355_s18 = int_to_ptr.vmem [resolvable:$true] %s354_s18 }
  0x12   : > { %s336_s26 = scalar_lea.sflag (!%p189_p10), [#allocation3], %s221_s8  ;;  %s544_s27 = scalar_lea.vmem (!%p189_p10), %s355_s18, 256 }
  0x13   : > { %p545_p12 = scmp.ne.s32.totalorder (!%p189_p10), %s355_s18, %s544_s27 }
  0x14   : > { %v622_v0 = vmov 0.0   ;;  %v623_v1 = vmov 0   ;;  %v245_v2 = vld [vmem:[%s752_s2] sm:$0xff]  ;;  %s226_s28 = scalar_select %p225_p11, %s612_s15, 1  ;;  %vm257_vm0 = vcmask 1043456   ;;  %vm253_vm1 = vcmask 31744  }
  0x15   : > { %326 = vmatprep.mubr.f32.mxu0 %v622_v0  ;;  %542 = vset.pattern.permute.xlu0 %v623_v1  ;;  %v243_v5 = vld [vmem:[%s751_s1] sm:$0xff]  ;;  %p546_p13 = pnand %p545_p12, %p685_p4 }
  0x16   : > { %248 = vperm.xlu0 %542, %v245_v2   ;;  %s483_s29 = sshll.u32 %s226_s28, 3  ;;  %s624_s28 = smov [#allocation2]  }
  0x17   : > { %s232_s5 = scalar_lea.vmem %s750_s0, %s483_s29  ;;  %p547_p0 = pneg %p546_p13 }
  0x18   : > { %v244_v3 = vld [vmem:[%s232_s5] sm:$0xff]  ;;  %s548_s15 = sshll.u32 %s624_s28, 4  ;;  %s549_s15 = int_to_ptr.vmem [resolvable:$false] %s548_s15 }
  0x19   : > { %v252_v4 = vcombine.high %v244_v3, %v244_v3  ;;  %s550_s29 = scalar_lea.vmem %s549_s15, 512  ;;  %p551_p1 = scmp.lt.s32.totalorder %s355_s18, %s549_s15 }
  0x1a   : > { %p552_p2 = scmp.lt.s32.totalorder %s550_s29, %s544_s27 }
  0x1b   : > { %475 = vmatprep.subr.msk.mxu0 %vm257_vm0, %v252_v4 }
  0x1c   : > { %476 = vmatpush1.msk.msra.mxu0 %vm257_vm0, %v244_v3  ;;  %p553_p3 = por %p552_p2, %p551_p1 }
  0x1d   : > { %477 = vmatmul.mubr.msk.f32.vlgmr.msra.gmra.mxu0 %vm253_vm1, %v243_v5 }
  0x1e   : > { %p554_p5 = pnand %p553_p3, %p547_p0 }
  0x91   : > { %v249_v6 = vpop.permute.xlu0 %248 }
  0xdd   : > { %v328_v7 = vpop.f32.mrf.mxu0 }
  0xde   : > { %v329_v8 = vadd.f32 %v328_v7, %v249_v6 }
  0xdf   : > { %v330_v9 = vpop.f32.mrf.mxu0 }
  0xe0   : > { %333 = vst [vmem:[%s223_s11] sm:$0xff] %v329_v8  ;;  %v331_v10 = vadd.f32 %v330_v9, %v249_v6 }
  0xe2   : > { %334 = vst [vmem:[%s223_s11 + $0x8] sm:$0xff] %v331_v10 }
  0xe3   : > { %557 = shalt.err (!%p554_p5)
}
  0xe4   : > { %s558_s30 = scalar_lea.hbm %s352_s23, 256  ;;  %s562_s6 = scalar_lea.hbm %s753_s3, 512 }
  0xe5   : > { %p559_p6 = scmp.ne.s32.totalorder %s352_s23, %s558_s30  ;;  %p563_p10 = scmp.lt.s32.totalorder %s352_s23, %s753_s3 }
  0xe6   : > { %p564_p11 = scmp.lt.s32.totalorder %s562_s6, %s558_s30 }
  0xe7   : > { %p560_p7 = pnand %p559_p6, %p685_p4 }
  0xe8   : > { %p565_p12 = por %p564_p11, %p563_p10 }
  0xe9   : > { %p561_p9 = pneg %p560_p7 }
  0xeb   : > { %p566_p13 = pnand %p565_p12, %p561_p9 }
  0xed   : > { %569 = shalt.err (!%p566_p13)
}
  0xee   : > { %485 = dma.vmem_to_hbm [thread:$0]  (%p685_p4), %s355_s18, 256, %s352_s23, %s336_s26  }
  0xef PF: > { %p491_p0 = scmp.ge.s32.totalorder %s620_s17, 2  ;;  %s366_s9 = sand.u32 1, %s600_s12  }
  0xf0   : > { %s367_s10 = scalar_lea.sflag [#allocation3], %s366_s9 }
  0xf1   : > { %p488_p1 = pnand %p491_p0, %p692_p8 }
  0xf3   : > { %p489_p2 = pneg %p488_p1 }
  0xf5   : > { %595 = dma.done.wait (%p489_p2), %s367_s10, 256  }
  0xf6   : > { %597 = vsyncadd (%p489_p2), %s367_s10, 4294967040  ;;  %s16_s17 = sadd.s32 1, %s620_s17   ;;  %s756_s12 = smov %s604_s13 }
  0xf7   : > { %p13_p3 = scmp.ge.s32.totalorder %s16_s17, 4   ;;  %s757_s13 = smov %s608_s14 }
  0xf8   : > { %s758_s14 = smov %s698_s25  ;;  %s759_s15 = smov %s616_s16 }
  0xf9   : > { %s760_s16 = smov %s762_s20  ;;  %15 = sbr.rel (!%p13_p3) target bundleno = 4 (0x4), region = 73 }
  0xfe   :  { %372 = vsyncpa [#allocation3], 1 }
  0xff   :  { %374 = vsyncpa [#allocation3 + $0x1], 1 }

</bundles_post_ra>
